<compile_context>
chip_gen: v7x
topology: tpu7x:2x2x1
jax: 0.10.0
libtpu: 0.0.40
codegen_flags: <defaults>
</compile_context>

<pallas_src>
import functools

import jax
import jax.numpy as jnp
from jax.experimental import pallas as pl
from jax.experimental.pallas import tpu as pltpu


def _conv3x3_tap_kernel(x_ref, w_ref, o_ref, *, row_stride, m):
    # x_ref: (Cin, P_in)    zero-padded, spatially-flattened image (one batch element)
    # w_ref: (9, Cout, Cin) resident weights, tap-major (kh*3 + kw)
    # o_ref: (Cout, M)      lane-dense conv output on the padded row stride,
    #                       M = H * (W + 2) (2 junk columns per row, dropped in the wrapper)
    acc = jnp.zeros(o_ref.shape, jnp.float32)
    for kh in range(3):
        for kw in range(3):
            t = kh * 3 + kw
            off = kh * row_stride + kw                 # static flat offset of this tap
            x_tap = x_ref[:, off:off + m]              # (Cin, M) static lane-shifted slice
            acc = acc + jnp.dot(w_ref[t], x_tap,
                                preferred_element_type=jnp.float32)
    o_ref[...] = acc.astype(o_ref.dtype)


def _conv3x3_pallas(x_nchw, weight_oihw):
    """3x3 / stride 1 / pad 1 / no-bias conv.

    Returns (N, Cout, H*(W+2)): conv output on the padded row stride (the last
    two columns of every row are junk and sliced off by the caller).
    """
    N, Cin, H, W = x_nchw.shape
    Cout = weight_oihw.shape[0]
    Wp = W + 2                      # padded row stride (lanes between consecutive rows)
    M = H * Wp                      # output columns per image (incl. 2 junk cols/row)
    P_in = (H + 3) * Wp             # 1 top pad row + 2 bottom pad rows (extra row = tap halo)

    # Single zero-pad + flatten; stays in the NCHW channel/spatial layout
    # (channels -> sublanes, flat pixels -> lanes), so no transposes are needed.
    x_pad = jnp.pad(x_nchw, ((0, 0), (0, 0), (1, 2), (1, 1)))
    x_flat = x_pad.reshape(N, Cin, P_in)

    # Weight (Cout, Cin, 3, 3) -> (9, Cout, Cin), tap-major to match the offsets above.
    w = jnp.transpose(weight_oihw, (2, 3, 0, 1)).reshape(9, Cout, Cin)

    kernel = functools.partial(_conv3x3_tap_kernel, row_stride=Wp, m=M)

    cost = pl.CostEstimate(
        flops=2 * N * M * 9 * Cin * Cout,
        transcendentals=0,
        # ~1x padded input + weight + output (no im2col inflation any more).
        bytes_accessed=4 * (N * Cin * P_in + 9 * Cout * Cin + N * Cout * M),
    )

    conv_flat = pl.pallas_call(
        kernel,
        out_shape=jax.ShapeDtypeStruct((N, Cout, M), x_nchw.dtype),
        grid_spec=pltpu.PrefetchScalarGridSpec(
            num_scalar_prefetch=0,
            grid=(N,),  # one image per step (~288 lane-dense cols); "parallel" feeds both v7x TCs
            in_specs=[
                pl.BlockSpec((None, Cin, P_in), lambda n: (n, 0, 0)),
                pl.BlockSpec((9, Cout, Cin), lambda n: (0, 0, 0)),   # resident weight
            ],
            out_specs=pl.BlockSpec((None, Cout, M), lambda n: (n, 0, 0)),
        ),
        compiler_params=pltpu.CompilerParams(
            dimension_semantics=("parallel",),
        ),
        cost_estimate=cost,
    )(x_flat, w)
    return conv_flat  # (N, Cout, M)


def upsample_forward(x_nchw, weight_oihw):
    """Conv2d(n_feat, 2*n_feat, 3, pad=1, bias=False) -> PixelShuffle(2).

    x: (N, Cin, H, W), weight: (2*Cin, Cin, 3, 3).
    Returns (N, Cin//2, 2H, 2W) NCHW, matching the PyTorch module.
    """
    N, Cin, H, W = x_nchw.shape
    Cout = weight_oihw.shape[0]
    r = 2
    C_ps = Cout // (r * r)
    Wp = W + 2

    conv_flat = _conv3x3_pallas(x_nchw, weight_oihw)          # (N, Cout, H*(W+2))
    conv = conv_flat.reshape(N, Cout, H, Wp)[:, :, :, :W]     # drop 2 junk cols per row

    # PixelShuffle(2): out[n, c, 2h+i, 2w+j] = conv[n, c*4 + i*2 + j, h, w]
    y = conv.reshape(N, C_ps, r, r, H, W)
    y = jnp.transpose(y, (0, 1, 4, 2, 5, 3))                  # N, C_ps, H, i, W, j
    return y.reshape(N, C_ps, H * r, W * r)


upsample_forward_jit = jax.jit(upsample_forward)


# ---------------- reference (pure XLA) ----------------
def _pixel_shuffle_ref(x_nchw, r):
    N, Crr, H, W = x_nchw.shape
    C = Crr // (r * r)
    y = x_nchw.reshape(N, C, r, r, H, W)
    y = jnp.transpose(y, (0, 1, 4, 2, 5, 3))
    return y.reshape(N, C, H * r, W * r)


def _reference(x_nchw, weight_oihw):
    y = jax.lax.conv_general_dilated(
        x_nchw, weight_oihw, window_strides=(1, 1), padding=((1, 1), (1, 1)),
        dimension_numbers=("NCHW", "OIHW", "NCHW"))
    return _pixel_shuffle_ref(y, 2)


if __name__ == "__main__":
    key = jax.random.PRNGKey(0)
    k_x, k_w = jax.random.split(key)

    N, n_feat, H, W = 2, 4, 16, 16
    x = jax.random.normal(k_x, (N, n_feat, H, W), dtype=jnp.float32)
    # Conv2d(n_feat, 2*n_feat, 3, padding=1, bias=False): weight (2*n_feat, n_feat, 3, 3)
    weight = jax.random.normal(k_w, (2 * n_feat, n_feat, 3, 3), dtype=jnp.float32) * 0.1

    out = jax.block_until_ready(upsample_forward_jit(x, weight))
    ref = jax.block_until_ready(_reference(x, weight))

    assert out.shape == (N, n_feat // 2, 2 * H, 2 * W), out.shape
    err = float(jnp.max(jnp.abs(out - ref)))
    assert jnp.allclose(out, ref, atol=1e-4, rtol=1e-4), err
    print("KERNEL_OK")
</pallas_src>

<mosaic_0001>
module attributes {stable_mosaic.version = 11 : i64} {
  func.func @_conv3x3_tap_kernel(%arg0: i32, %arg1: memref<1x4x342xf32, #tpu.memory_space<vmem>>, %arg2: memref<9x8x4xf32, #tpu.memory_space<vmem>>, %arg3: memref<1x8x288xf32, #tpu.memory_space<vmem>>) attributes {dimension_semantics = [#tpu.dimension_semantics<parallel>], iteration_bounds = array<i64: 2>, scalar_prefetch = 0 : i64, scratch_operands = 0 : i64, tpu.core_type = #tpu.core_type<tc>, window_params = [{transform_indices = @transform_0, window_bounds = array<i64: 1, 4, 342>}, {pipeline_mode = #tpu.pipeline_mode<synchronous>, transform_indices = @transform_1, window_bounds = array<i64: 9, 8, 4>}, {transform_indices = @transform_2, window_bounds = array<i64: 1, 8, 288>}]} {
    %cst = arith.constant 0.000000e+00 : f32
    %0 = vector.broadcast %cst : f32 to vector<8x288xf32>
    %c0 = arith.constant 0 : index
    %c0_0 = arith.constant 0 : index
    %c0_1 = arith.constant 0 : index
    %1 = vector.load %arg1[%c0, %c0_0, %c0_1] : memref<1x4x342xf32, #tpu.memory_space<vmem>>, vector<1x4x288xf32>
    %2 = vector.shape_cast %1 : vector<1x4x288xf32> to vector<4x288xf32>
    %c0_2 = arith.constant 0 : index
    %c0_3 = arith.constant 0 : index
    %c0_4 = arith.constant 0 : index
    %3 = vector.load %arg2[%c0_2, %c0_3, %c0_4] : memref<9x8x4xf32, #tpu.memory_space<vmem>>, vector<1x8x4xf32>
    %4 = vector.shape_cast %3 : vector<1x8x4xf32> to vector<8x4xf32>
    %cst_5 = arith.constant dense<0.000000e+00> : vector<8x288xf32>
    %5 = tpu.matmul %4, %2, %cst_5 {dimension_numbers = #tpu.dot_dimension_numbers<[1], [0], [0], [1], [0, 0, 1, 1], [], []>} : vector<8x4xf32>, vector<4x288xf32>, vector<8x288xf32> -> vector<8x288xf32>
    %6 = arith.addf %0, %5 : vector<8x288xf32>
    %c0_6 = arith.constant 0 : index
    %c0_7 = arith.constant 0 : index
    %c1 = arith.constant 1 : index
    %7 = vector.load %arg1[%c0_6, %c0_7, %c1] : memref<1x4x342xf32, #tpu.memory_space<vmem>>, vector<1x4x288xf32>
    %8 = vector.shape_cast %7 : vector<1x4x288xf32> to vector<4x288xf32>
    %c1_8 = arith.constant 1 : index
    %c0_9 = arith.constant 0 : index
    %c0_10 = arith.constant 0 : index
    %9 = vector.load %arg2[%c1_8, %c0_9, %c0_10] : memref<9x8x4xf32, #tpu.memory_space<vmem>>, vector<1x8x4xf32>
    %10 = vector.shape_cast %9 : vector<1x8x4xf32> to vector<8x4xf32>
    %cst_11 = arith.constant dense<0.000000e+00> : vector<8x288xf32>
    %11 = tpu.matmul %10, %8, %cst_11 {dimension_numbers = #tpu.dot_dimension_numbers<[1], [0], [0], [1], [0, 0, 1, 1], [], []>} : vector<8x4xf32>, vector<4x288xf32>, vector<8x288xf32> -> vector<8x288xf32>
    %12 = arith.addf %6, %11 : vector<8x288xf32>
    %c0_12 = arith.constant 0 : index
    %c0_13 = arith.constant 0 : index
    %c2 = arith.constant 2 : index
    %13 = vector.load %arg1[%c0_12, %c0_13, %c2] : memref<1x4x342xf32, #tpu.memory_space<vmem>>, vector<1x4x288xf32>
    %14 = vector.shape_cast %13 : vector<1x4x288xf32> to vector<4x288xf32>
    %c2_14 = arith.constant 2 : index
    %c0_15 = arith.constant 0 : index
    %c0_16 = arith.constant 0 : index
    %15 = vector.load %arg2[%c2_14, %c0_15, %c0_16] : memref<9x8x4xf32, #tpu.memory_space<vmem>>, vector<1x8x4xf32>
    %16 = vector.shape_cast %15 : vector<1x8x4xf32> to vector<8x4xf32>
    %cst_17 = arith.constant dense<0.000000e+00> : vector<8x288xf32>
    %17 = tpu.matmul %16, %14, %cst_17 {dimension_numbers = #tpu.dot_dimension_numbers<[1], [0], [0], [1], [0, 0, 1, 1], [], []>} : vector<8x4xf32>, vector<4x288xf32>, vector<8x288xf32> -> vector<8x288xf32>
    %18 = arith.addf %12, %17 : vector<8x288xf32>
    %c0_18 = arith.constant 0 : index
    %c0_19 = arith.constant 0 : index
    %c18 = arith.constant 18 : index
    %19 = vector.load %arg1[%c0_18, %c0_19, %c18] : memref<1x4x342xf32, #tpu.memory_space<vmem>>, vector<1x4x288xf32>
    %20 = vector.shape_cast %19 : vector<1x4x288xf32> to vector<4x288xf32>
    %c3 = arith.constant 3 : index
    %c0_20 = arith.constant 0 : index
    %c0_21 = arith.constant 0 : index
    %21 = vector.load %arg2[%c3, %c0_20, %c0_21] : memref<9x8x4xf32, #tpu.memory_space<vmem>>, vector<1x8x4xf32>
    %22 = vector.shape_cast %21 : vector<1x8x4xf32> to vector<8x4xf32>
    %cst_22 = arith.constant dense<0.000000e+00> : vector<8x288xf32>
    %23 = tpu.matmul %22, %20, %cst_22 {dimension_numbers = #tpu.dot_dimension_numbers<[1], [0], [0], [1], [0, 0, 1, 1], [], []>} : vector<8x4xf32>, vector<4x288xf32>, vector<8x288xf32> -> vector<8x288xf32>
    %24 = arith.addf %18, %23 : vector<8x288xf32>
    %c0_23 = arith.constant 0 : index
    %c0_24 = arith.constant 0 : index
    %c19 = arith.constant 19 : index
    %25 = vector.load %arg1[%c0_23, %c0_24, %c19] : memref<1x4x342xf32, #tpu.memory_space<vmem>>, vector<1x4x288xf32>
    %26 = vector.shape_cast %25 : vector<1x4x288xf32> to vector<4x288xf32>
    %c4 = arith.constant 4 : index
    %c0_25 = arith.constant 0 : index
    %c0_26 = arith.constant 0 : index
    %27 = vector.load %arg2[%c4, %c0_25, %c0_26] : memref<9x8x4xf32, #tpu.memory_space<vmem>>, vector<1x8x4xf32>
    %28 = vector.shape_cast %27 : vector<1x8x4xf32> to vector<8x4xf32>
    %cst_27 = arith.constant dense<0.000000e+00> : vector<8x288xf32>
    %29 = tpu.matmul %28, %26, %cst_27 {dimension_numbers = #tpu.dot_dimension_numbers<[1], [0], [0], [1], [0, 0, 1, 1], [], []>} : vector<8x4xf32>, vector<4x288xf32>, vector<8x288xf32> -> vector<8x288xf32>
    %30 = arith.addf %24, %29 : vector<8x288xf32>
    %c0_28 = arith.constant 0 : index
    %c0_29 = arith.constant 0 : index
    %c20 = arith.constant 20 : index
    %31 = vector.load %arg1[%c0_28, %c0_29, %c20] : memref<1x4x342xf32, #tpu.memory_space<vmem>>, vector<1x4x288xf32>
    %32 = vector.shape_cast %31 : vector<1x4x288xf32> to vector<4x288xf32>
    %c5 = arith.constant 5 : index
    %c0_30 = arith.constant 0 : index
    %c0_31 = arith.constant 0 : index
    %33 = vector.load %arg2[%c5, %c0_30, %c0_31] : memref<9x8x4xf32, #tpu.memory_space<vmem>>, vector<1x8x4xf32>
    %34 = vector.shape_cast %33 : vector<1x8x4xf32> to vector<8x4xf32>
    %cst_32 = arith.constant dense<0.000000e+00> : vector<8x288xf32>
    %35 = tpu.matmul %34, %32, %cst_32 {dimension_numbers = #tpu.dot_dimension_numbers<[1], [0], [0], [1], [0, 0, 1, 1], [], []>} : vector<8x4xf32>, vector<4x288xf32>, vector<8x288xf32> -> vector<8x288xf32>
    %36 = arith.addf %30, %35 : vector<8x288xf32>
    %c0_33 = arith.constant 0 : index
    %c0_34 = arith.constant 0 : index
    %c36 = arith.constant 36 : index
    %37 = vector.load %arg1[%c0_33, %c0_34, %c36] : memref<1x4x342xf32, #tpu.memory_space<vmem>>, vector<1x4x288xf32>
    %38 = vector.shape_cast %37 : vector<1x4x288xf32> to vector<4x288xf32>
    %c6 = arith.constant 6 : index
    %c0_35 = arith.constant 0 : index
    %c0_36 = arith.constant 0 : index
    %39 = vector.load %arg2[%c6, %c0_35, %c0_36] : memref<9x8x4xf32, #tpu.memory_space<vmem>>, vector<1x8x4xf32>
    %40 = vector.shape_cast %39 : vector<1x8x4xf32> to vector<8x4xf32>
    %cst_37 = arith.constant dense<0.000000e+00> : vector<8x288xf32>
    %41 = tpu.matmul %40, %38, %cst_37 {dimension_numbers = #tpu.dot_dimension_numbers<[1], [0], [0], [1], [0, 0, 1, 1], [], []>} : vector<8x4xf32>, vector<4x288xf32>, vector<8x288xf32> -> vector<8x288xf32>
    %42 = arith.addf %36, %41 : vector<8x288xf32>
    %c0_38 = arith.constant 0 : index
    %c0_39 = arith.constant 0 : index
    %c37 = arith.constant 37 : index
    %43 = vector.load %arg1[%c0_38, %c0_39, %c37] : memref<1x4x342xf32, #tpu.memory_space<vmem>>, vector<1x4x288xf32>
    %44 = vector.shape_cast %43 : vector<1x4x288xf32> to vector<4x288xf32>
    %c7 = arith.constant 7 : index
    %c0_40 = arith.constant 0 : index
    %c0_41 = arith.constant 0 : index
    %45 = vector.load %arg2[%c7, %c0_40, %c0_41] : memref<9x8x4xf32, #tpu.memory_space<vmem>>, vector<1x8x4xf32>
    %46 = vector.shape_cast %45 : vector<1x8x4xf32> to vector<8x4xf32>
    %cst_42 = arith.constant dense<0.000000e+00> : vector<8x288xf32>
    %47 = tpu.matmul %46, %44, %cst_42 {dimension_numbers = #tpu.dot_dimension_numbers<[1], [0], [0], [1], [0, 0, 1, 1], [], []>} : vector<8x4xf32>, vector<4x288xf32>, vector<8x288xf32> -> vector<8x288xf32>
    %48 = arith.addf %42, %47 : vector<8x288xf32>
    %c0_43 = arith.constant 0 : index
    %c0_44 = arith.constant 0 : index
    %c38 = arith.constant 38 : index
    %49 = vector.load %arg1[%c0_43, %c0_44, %c38] : memref<1x4x342xf32, #tpu.memory_space<vmem>>, vector<1x4x288xf32>
    %50 = vector.shape_cast %49 : vector<1x4x288xf32> to vector<4x288xf32>
    %c8 = arith.constant 8 : index
    %c0_45 = arith.constant 0 : index
    %c0_46 = arith.constant 0 : index
    %51 = vector.load %arg2[%c8, %c0_45, %c0_46] : memref<9x8x4xf32, #tpu.memory_space<vmem>>, vector<1x8x4xf32>
    %52 = vector.shape_cast %51 : vector<1x8x4xf32> to vector<8x4xf32>
    %cst_47 = arith.constant dense<0.000000e+00> : vector<8x288xf32>
    %53 = tpu.matmul %52, %50, %cst_47 {dimension_numbers = #tpu.dot_dimension_numbers<[1], [0], [0], [1], [0, 0, 1, 1], [], []>} : vector<8x4xf32>, vector<4x288xf32>, vector<8x288xf32> -> vector<8x288xf32>
    %54 = arith.addf %48, %53 : vector<8x288xf32>
    %c0_48 = arith.constant 0 : index
    %c0_49 = arith.constant 0 : index
    %c0_50 = arith.constant 0 : index
    %55 = vector.load %arg3[%c0_48, %c0_49, %c0_50] : memref<1x8x288xf32, #tpu.memory_space<vmem>>, vector<1x8x288xf32>
    %56 = vector.shape_cast %55 : vector<1x8x288xf32> to vector<8x288xf32>
    %57 = vector.shape_cast %54 : vector<8x288xf32> to vector<1x8x288xf32>
    tpu.vector_store %arg3[%c0_48, %c0_49, %c0_50], %57 {strides = array<i32>} : memref<1x8x288xf32, #tpu.memory_space<vmem>>, vector<1x8x288xf32>,
    return
  }
  func.func @transform_0(%arg0: i32) -> (i32, i32, i32) {
    %c0_i32 = arith.constant 0 : i32
    %c0_i32_0 = arith.constant 0 : i32
    %c0_i32_1 = arith.constant 0 : i32
    return %arg0, %c0_i32, %c0_i32_0 : i32, i32, i32
  }
  func.func @transform_1(%arg0: i32) -> (i32, i32, i32) {
    %c0_i32 = arith.constant 0 : i32
    %c0_i32_0 = arith.constant 0 : i32
    %c0_i32_1 = arith.constant 0 : i32
    %c0_i32_2 = arith.constant 0 : i32
    return %c0_i32, %c0_i32_0, %c0_i32_1 : i32, i32, i32
  }
  func.func @transform_2(%arg0: i32) -> (i32, i32, i32) {
    %c0_i32 = arith.constant 0 : i32
    %c0_i32_0 = arith.constant 0 : i32
    %c0_i32_1 = arith.constant 0 : i32
    return %arg0, %c0_i32, %c0_i32_0 : i32, i32, i32
  }
}

</mosaic_0001>

<bundles_post_ra>
// kernel: upsample_forward.1
= control target key start
LH: loop header
LB: loop body
LE: loop exit
PB: predicated region body
PF: predicated region fallthrough
CT: control target
= control target key end

     0   :  { %s1916_s9 = smov 0   ;;  %s2068_s0 = inlined_call_operand.vmem [shape: f32[2,4,342], index: 0, kind: input, shape index: {}]   ;;  %s2069_s1 = inlined_call_operand.vmem [shape: f32[9,8,4], index: 1, kind: input, shape index: {}]   ;;  %s2070_s2 = inlined_call_operand.vmem [shape: f32[2,8,288], index: 2, kind: output, shape index: {}]  }
   0x1 LB: > { %s1705_s10 = sadd.s32 4294967295, %s1889_s9   ;;  %p1709_p0 = scmp.ge.s32.totalorder %s1889_s9, 1  ;;  %s1889_s9 = sphi %s1916_s9, %s12_s9  }
   0x2   : > { %p112_p1 = scmp.lt.s32.totalorder %s1889_s9, 3 }
   0x4   : > { %p113_p2 = pnand %p1709_p0, %p112_p1 }
   0x5   : > { %p134_p3 = scmp.lt.s32.totalorder (!%p113_p2), %s1705_s10, 1  ;;  %v1891_v0 = vmov (!%p113_p2), 0.0   ;;  %vm1892_vm0 = vmmov (!%p113_p2), 0   ;;  %s1893_s15 = smov (!%p113_p2), 127   ;;  %vm165_vm1 = vcmask (!%p113_p2), 1043456   ;;  %vm158_vm2 = vcmask (!%p113_p2), 1039360  }
   0x6   : > { %116 = sbr.rel (%p113_p2) target bundleno = 420 (0x1a4), region = 28  ;;  %1785 = vmatprep.subr.mxu1 (!%p113_p2), %v1891_v0  ;;  %1787 = vmatprep.mubr.msk.f32.mxu1 (!%p113_p2), %vm1892_vm0, %v1891_v0  ;;  %s1894_s16 = smov (!%p113_p2), 126   ;;  %v1712_v14 = vld [vmem:[%s2069_s1 + $0x8] sm:$0xff] (!%p113_p2)  ;;  %vm161_vm3 = vcmask (!%p113_p2), 31744   ;;  %vm476_vm4 = vcmask (!%p113_p2), 1031168   ;;  %v146_v21 = vld [vmem:[%s2069_s1] sm:$0xff] (!%p113_p2) }
   0x7   : > { %236 = vmatprep.mubr.f32.mxu0 (!%p113_p2), %v1891_v0  ;;  %s1895_s17 = smov (!%p113_p2), 110   ;;  %s1896_s18 = smov (!%p113_p2), 109   ;;  %vm645_vm5 = vcmask (!%p113_p2), 900096   ;;  %v1723_v28 = vld [vmem:[%s2069_s1 + $0x10] sm:$0xff] (!%p113_p2)  ;;  %vm814_vm6 = vcmask (!%p113_p2), 891904   ;;  %v1729_v34 = vld [vmem:[%s2069_s1 + $0x18] sm:$0xff] (!%p113_p2) }
   0x8   : > { %s1897_s19 = smov (!%p113_p2), 108   ;;  %s1898_s20 = smov (!%p113_p2), 92   ;;  %vm983_vm7 = vcmask (!%p113_p2), 883712   ;;  %v1735_v40 = vld [vmem:[%s2069_s1 + $0x20] sm:$0xff] (!%p113_p2)  ;;  %vm1152_vm8 = vcmask (!%p113_p2), 752640   ;;  %v1741_v46 = vld [vmem:[%s2069_s1 + $0x28] sm:$0xff] (!%p113_p2) }
   0x9   : > { %s1899_s21 = smov (!%p113_p2), 91   ;;  %s1900_s22 = smov (!%p113_p2), 90   ;;  %vm1321_vm9 = vcmask (!%p113_p2), 744448   ;;  %v1747_v51 = vld [vmem:[%s2069_s1 + $0x30] sm:$0xff] (!%p113_p2)  ;;  %vm1490_vm10 = vcmask (!%p113_p2), 736256   ;;  %v1753_v57 = vld [vmem:[%s2069_s1 + $0x38] sm:$0xff] (!%p113_p2) }
   0xa   : > { %v1759_v59 = vld [vmem:[%s2069_s1 + $0x40] sm:$0xff] (!%p113_p2)  ;;  %vm1648_vm11 = vcmask (!%p113_p2), 261120  }
   0xd   : > { %s2072_s10 = smov (!%p134_p3, %s1705_s10), 1 }
   0xe   : > { %s1862_s11 = smul.u32 12, %s2072_s10 }
  0x10   : > { %s1934_s14 = scalar_lea.vmem %s2068_s0, %s1862_s11 }
  0x11   : > { %v144_v1 = vld [vmem:[%s1934_s14] sm:$0xff]  ;;  %v145_v3 = vld [vmem:[%s1934_s14 + $0x8] sm:$0xf] }
  0x12   : > { %152 = vrot.lane.b32.xlu1 %v144_v1, %s1893_s15  ;;  %v151_v2 = vcombine.high %v144_v1, %v144_v1  ;;  %v464_v4 = vld [vmem:[%s1934_s14 + $0x8] sm:$0xf] }
  0x13   : > { %v633_v5 = vld [vmem:[%s1934_s14 + $0x8] sm:$0xf] }
  0x14   : > { %154 = vrot.lane.b32.xlu0 %v151_v2, %s1893_s15  ;;  %v802_v6 = vld [vmem:[%s1934_s14 + $0x8] sm:$0xf] }
  0x15   : > { %v971_v7 = vld [vmem:[%s1934_s14 + $0x8] sm:$0xf] }
  0x16   : > { %472 = vrot.lane.b32.xlu1 %v151_v2, %s1894_s16  ;;  %v1140_v8 = vld [vmem:[%s1934_s14 + $0x8] sm:$0xf] }
  0x17   : > { %v1309_v9 = vld [vmem:[%s1934_s14 + $0x8] sm:$0xf] }
  0x18   : > { %156 = vrot.lane.b32.xlu0 %v145_v3, %s1893_s15  ;;  %v1478_v10 = vld [vmem:[%s1934_s14 + $0x8] sm:$0xf]  ;;  %s1863_s15 = smul.u32 24, %s2072_s10 }
  0x1a   : > { %470 = vrot.lane.b32.xlu1 %v144_v1, %s1894_s16 }
  0x1c   : > { %474 = vrot.lane.b32.xlu0 %v464_v4, %s1894_s16 }
  0x1e   : > { %643 = vrot.lane.b32.xlu1 %v633_v5, %s1895_s17 }
  0x20   : > { %641 = vrot.lane.b32.xlu0 %v151_v2, %s1895_s17 }
  0x22   : > { %810 = vrot.lane.b32.xlu1 %v151_v2, %s1896_s18 }
  0x24   : > { %639 = vrot.lane.b32.xlu0 %v144_v1, %s1895_s17 }
  0x26   : > { %808 = vrot.lane.b32.xlu1 %v144_v1, %s1896_s18 }
  0x28   : > { %812 = vrot.lane.b32.xlu0 %v802_v6, %s1896_s18  ;;  %s143_s18 = scalar_lea.vmem %s2070_s2, %s1863_s15 }
  0x2a   : > { %981 = vrot.lane.b32.xlu1 %v971_v7, %s1897_s19 }
  0x2c   : > { %979 = vrot.lane.b32.xlu0 %v151_v2, %s1897_s19 }
  0x2e   : > { %1148 = vrot.lane.b32.xlu1 %v151_v2, %s1898_s20 }
  0x30   : > { %977 = vrot.lane.b32.xlu0 %v144_v1, %s1897_s19 }
  0x32   : > { %1146 = vrot.lane.b32.xlu1 %v144_v1, %s1898_s20 }
  0x34   : > { %1150 = vrot.lane.b32.xlu0 %v1140_v8, %s1898_s20 }
  0x36   : > { %1319 = vrot.lane.b32.xlu1 %v1309_v9, %s1899_s21 }
  0x38   : > { %1317 = vrot.lane.b32.xlu0 %v151_v2, %s1899_s21 }
  0x3a   : > { %1486 = vrot.lane.b32.xlu1 %v151_v2, %s1900_s22 }
  0x3c   : > { %1315 = vrot.lane.b32.xlu0 %v144_v1, %s1899_s21 }
  0x3e   : > { %1484 = vrot.lane.b32.xlu1 %v144_v1, %s1900_s22 }
  0x40   : > { %1488 = vrot.lane.b32.xlu0 %v1478_v10, %s1900_s22 }
  0x84   : > { %v153_v11 = vpop.permute.xlu1 %152 }
  0x86   : > { %v155_v12 = vpop.permute.xlu0 %154 }
  0x87   : > { %v159_v17 = vsel %vm158_vm2, %v153_v11, %v155_v12 }
  0x88   : > { %v473_v13 = vpop.permute.xlu1 %472 }
  0x8a   : > { %v157_v15 = vpop.permute.xlu0 %156 }
  0x8b   : > { %1786 = vmatpush3.msk.msra.mxu1 %vm165_vm1, %v157_v15  ;;  %v160_v16 = vsel %vm158_vm2, %v155_v12, %v157_v15 }
  0x8c   : > { %1713 = vmatprep.subr.msk.mxu0 %vm165_vm1, %v160_v16  ;;  %1788 = vmatmul.mubr.msk.f32.vlgmr.msra.gmra.mrb[0].mxu1 %vm161_vm3, %v1712_v14  ;;  %v471_v18 = vpop.permute.xlu1 %470 }
  0x8d   : > { %1714 = vmatpush1.msk.msra.mxu0 %vm165_vm1, %v159_v17  ;;  %1790 = vmatprep.subr.mxu1 %v1891_v0  ;;  %v477_v24 = vsel %vm476_vm4, %v471_v18, %v473_v13 }
  0x8e   : > { %1715 = vmatmul.mubr.msk.f32.vlgmr.msra.gmra.mrb[0].mxu0 %vm161_vm3, %v1712_v14  ;;  %1718 = vmatprep.subr.msk.mxu0 %vm165_vm1, %v151_v2  ;;  %v475_v19 = vpop.permute.xlu0 %474 }
  0x8f   : > { %1719 = vmatpush1.msk.msra.mxu0 %vm165_vm1, %v144_v1  ;;  %1791 = vmatpush3.msk.msra.mxu1 %vm165_vm1, %v145_v3  ;;  %v478_v20 = vsel %vm476_vm4, %v473_v13, %v475_v19 }
  0x90   : > { %1792 = vmatprep.mubr.msk.f32.mxu1 %vm1892_vm0, %v1891_v0  ;;  %1724 = vmatprep.subr.msk.mxu0 %vm165_vm1, %v478_v20  ;;  %v644_v23 = vpop.permute.xlu1 %643 }
  0x91   : > { %1795 = vmatprep.subr.mxu1 %v1891_v0  ;;  %386 = vmatprep.mubr.f32.mxu0 %v1891_v0 }
  0x92   : > { %v642_v22 = vpop.permute.xlu0 %641 }
  0x93   : > { %v647_v25 = vsel %vm645_vm5, %v642_v22, %v644_v23 }
  0x94   : > { %1793 = vmatmul.mubr.msk.f32.vlgmr.msra.gmra.mrb[0].mxu1 %vm161_vm3, %v146_v21  ;;  %v811_v27 = vpop.permute.xlu1 %810 }
  0x95   : > { %1796 = vmatpush3.msk.msra.mxu1 %vm165_vm1, %v475_v19  ;;  %1797 = vmatprep.mubr.msk.f32.mxu1 %vm1892_vm0, %v1891_v0 }
  0x96   : > { %1720 = vmatmul.mubr.msk.f32.vlgmr.msra.gmra.mrb[0].mxu0 %vm161_vm3, %v146_v21  ;;  %v640_v26 = vpop.permute.xlu0 %639  ;;  %1800 = vmatprep.subr.mxu1 %v1891_v0 }
  0x97   : > { %1725 = vmatpush1.msk.msra.mxu0 %vm165_vm1, %v477_v24  ;;  %552 = vmatprep.mubr.f32.mxu0 %v1891_v0  ;;  %v646_v30 = vsel %vm645_vm5, %v640_v26, %v642_v22 }
  0x98   : > { %1730 = vmatprep.subr.msk.mxu0 %vm165_vm1, %v647_v25  ;;  %v809_v32 = vpop.permute.xlu1 %808 }
  0x99   : > { %v815_v36 = vsel %vm814_vm6, %v809_v32, %v811_v27 }
  0x9a   : > { %v813_v29 = vpop.permute.xlu0 %812 }
  0x9b   : > { %v816_v31 = vsel %vm814_vm6, %v811_v27, %v813_v29 }
  0x9c   : > { %1798 = vmatmul.mubr.msk.f32.vlgmr.msra.gmra.mrb[0].mxu1 %vm161_vm3, %v1723_v28  ;;  %v982_v35 = vpop.permute.xlu1 %981 }
  0x9d   : > { %1801 = vmatpush3.msk.msra.mxu1 %vm165_vm1, %v644_v23  ;;  %1802 = vmatprep.mubr.msk.f32.mxu1 %vm1892_vm0, %v1891_v0 }
  0x9e   : > { %1726 = vmatmul.mubr.msk.f32.vlgmr.msra.gmra.mrb[0].mxu0 %vm161_vm3, %v1723_v28  ;;  %1805 = vmatprep.subr.mxu1 %v1891_v0  ;;  %v980_v33 = vpop.permute.xlu0 %979 }
  0x9f   : > { %1731 = vmatpush1.msk.msra.mxu0 %vm165_vm1, %v646_v30  ;;  %721 = vmatprep.mubr.f32.mxu0 %v1891_v0  ;;  %v985_v37 = vsel %vm983_vm7, %v980_v33, %v982_v35 }
  0xa0   : > { %1736 = vmatprep.subr.msk.mxu0 %vm165_vm1, %v816_v31  ;;  %v1149_v39 = vpop.permute.xlu1 %1148 }
  0xa2   : > { %v978_v38 = vpop.permute.xlu0 %977 }
  0xa3   : > { %v984_v42 = vsel %vm983_vm7, %v978_v38, %v980_v33 }
  0xa4   : > { %1803 = vmatmul.mubr.msk.f32.vlgmr.msra.gmra.mrb[0].mxu1 %vm161_vm3, %v1729_v34  ;;  %v1147_v44 = vpop.permute.xlu1 %1146 }
  0xa5   : > { %1806 = vmatpush3.msk.msra.mxu1 %vm165_vm1, %v813_v29  ;;  %1807 = vmatprep.mubr.msk.f32.mxu1 %vm1892_vm0, %v1891_v0  ;;  %v1153_v48 = vsel %vm1152_vm8, %v1147_v44, %v1149_v39 }
  0xa6   : > { %1732 = vmatmul.mubr.msk.f32.vlgmr.msra.gmra.mrb[0].mxu0 %vm161_vm3, %v1729_v34  ;;  %1810 = vmatprep.subr.mxu1 %v1891_v0  ;;  %v1151_v41 = vpop.permute.xlu0 %1150 }
  0xa7   : > { %1737 = vmatpush1.msk.msra.mxu0 %vm165_vm1, %v815_v36  ;;  %890 = vmatprep.mubr.f32.mxu0 %v1891_v0  ;;  %v1154_v43 = vsel %vm1152_vm8, %v1149_v39, %v1151_v41 }
  0xa8   : > { %1742 = vmatprep.subr.msk.mxu0 %vm165_vm1, %v985_v37  ;;  %v1320_v47 = vpop.permute.xlu1 %1319 }
  0xaa   : > { %v1318_v45 = vpop.permute.xlu0 %1317 }
  0xab   : > { %v1323_v49 = vsel %vm1321_vm9, %v1318_v45, %v1320_v47 }
  0xac   : > { %1808 = vmatmul.mubr.msk.f32.vlgmr.msra.gmra.mrb[0].mxu1 %vm161_vm3, %v1735_v40  ;;  %v1487_v53 = vpop.permute.xlu1 %1486 }
  0xad   : > { %1811 = vmatpush3.msk.msra.mxu1 %vm165_vm1, %v982_v35  ;;  %1812 = vmatprep.mubr.msk.f32.mxu1 %vm1892_vm0, %v1891_v0 }
  0xae   : > { %1738 = vmatmul.mubr.msk.f32.vlgmr.msra.gmra.mrb[0].mxu0 %vm161_vm3, %v1735_v40  ;;  %1815 = vmatprep.subr.mxu1 %v1891_v0  ;;  %v1316_v50 = vpop.permute.xlu0 %1315 }
  0xaf   : > { %1743 = vmatpush1.msk.msra.mxu0 %vm165_vm1, %v984_v42  ;;  %1059 = vmatprep.mubr.f32.mxu0 %v1891_v0  ;;  %v1322_v54 = vsel %vm1321_vm9, %v1316_v50, %v1318_v45 }
  0xb0   : > { %1748 = vmatprep.subr.msk.mxu0 %vm165_vm1, %v1154_v43  ;;  %v1485_v56 = vpop.permute.xlu1 %1484 }
  0xb1   : > { %v1491_v58 = vsel %vm1490_vm10, %v1485_v56, %v1487_v53 }
  0xb2   : > { %v1489_v52 = vpop.permute.xlu0 %1488 }
  0xb3   : > { %v1492_v55 = vsel %vm1490_vm10, %v1487_v53, %v1489_v52 }
  0xb4   : > { %1813 = vmatmul.mubr.msk.f32.vlgmr.msra.gmra.mrb[0].mxu1 %vm161_vm3, %v1741_v46 }
  0xb5   : > { %1816 = vmatpush3.msk.msra.mxu1 %vm165_vm1, %v1151_v41  ;;  %1817 = vmatprep.mubr.msk.f32.mxu1 %vm1892_vm0, %v1891_v0 }
  0xb6   : > { %1744 = vmatmul.mubr.msk.f32.vlgmr.msra.gmra.mrb[0].mxu0 %vm161_vm3, %v1741_v46  ;;  %1820 = vmatprep.subr.mxu1 %v1891_v0 }
  0xb7   : > { %1749 = vmatpush1.msk.msra.mxu0 %vm165_vm1, %v1153_v48  ;;  %1228 = vmatprep.mubr.f32.mxu0 %v1891_v0 }
  0xb8   : > { %1754 = vmatprep.subr.msk.mxu0 %vm165_vm1, %v1323_v49 }
  0xbc   : > { %1818 = vmatmul.mubr.msk.f32.vlgmr.msra.gmra.mrb[0].mxu1 %vm161_vm3, %v1747_v51 }
  0xbd   : > { %1821 = vmatpush3.msk.msra.mxu1 %vm165_vm1, %v1320_v47  ;;  %1822 = vmatprep.mubr.msk.f32.mxu1 %vm1892_vm0, %v1891_v0 }
  0xbe   : > { %1750 = vmatmul.mubr.msk.f32.vlgmr.msra.gmra.mrb[0].mxu0 %vm161_vm3, %v1747_v51  ;;  %1825 = vmatprep.subr.mxu1 %v1891_v0 }
  0xbf   : > { %1755 = vmatpush1.msk.msra.mxu0 %vm165_vm1, %v1322_v54  ;;  %1397 = vmatprep.mubr.f32.mxu0 %v1891_v0 }
  0xc0   : > { %1760 = vmatprep.subr.msk.mxu0 %vm165_vm1, %v1492_v55 }
  0xc4   : > { %1823 = vmatmul.mubr.msk.f32.vlgmr.msra.gmra.mrb[0].mxu1 %vm161_vm3, %v1753_v57 }
  0xc5   : > { %1826 = vmatpush3.msk.msra.mxu1 %vm165_vm1, %v1489_v52  ;;  %1827 = vmatprep.mubr.msk.f32.mxu1 %vm1892_vm0, %v1891_v0 }
  0xc6   : > { %1756 = vmatmul.mubr.msk.f32.vlgmr.msra.gmra.mrb[0].mxu0 %vm161_vm3, %v1753_v57 }
  0xc7   : > { %1761 = vmatpush1.msk.msra.mxu0 %vm165_vm1, %v1491_v58  ;;  %1566 = vmatprep.mubr.f32.mxu0 %v1891_v0 }
  0xcc   : > { %1828 = vmatmul.mubr.msk.f32.vlgmr.msra.gmra.mrb[0].mxu1 %vm161_vm3, %v1759_v59 }
  0xce   : > { %1762 = vmatmul.mubr.msk.f32.vlgmr.msra.gmra.mrb[0].mxu0 %vm161_vm3, %v1759_v59 }
 0x19f   : > { %v1639_v60 = vpop.f32.mrb[0].mxu1 }
 0x1a0   : > { %1649 = vst.msk [vmem:[%s143_s18 + $0x10] sm:$0xff] %vm1648_vm11, %v1639_v60  ;;  %v1829_v61 = vpop.f32.mrb[1].mxu1 }
 0x1a1   : > { %v1568_v62 = vpop.f32.mrb[0].mxu0 }
 0x1a2   : > { %1646 = vst [vmem:[%s143_s18] sm:$0xff] %v1568_v62  ;;  %v1570_v63 = vpop.f32.mrb[1].mxu0 }
 0x1a3   : > { %1647 = vst [vmem:[%s143_s18 + $0x8] sm:$0xff] %v1570_v63 }
 0x1a4 PF: > { %s12_s9 = sadd.s32 1, %s1889_s9  }
 0x1a5   : > { %p9_p4 = scmp.ge.s32.totalorder %s12_s9, 4  }
 0x1a7   :  { %11 = sbr.rel (!%p9_p4) target bundleno = 1 (0x1), region = 66 }

</bundles_post_ra>
